<compile_context>
chip_gen: v7x
topology: tpu7x:2x2x1
jax: 0.10.0
libtpu: 0.0.40
codegen_flags: <defaults>
</compile_context>

<pallas_src>
import functools

import jax
import jax.numpy as jnp
from jax.experimental import pallas as pl
from jax.experimental.pallas import tpu as pltpu

# ------------------------- model dimensions (small, synthetic) -------------------
B = 2            # batch
CIN = 1          # input channels (e.g. MRI volume)
D = H = W = 8    # spatial extent
COUT = 8         # conv output channels
K = 3            # conv kernel size, padding=1, stride=1
NUM_CLASSES = 2
V = D * H * W            # voxels per volume (512)
BV = B * V               # 1024, lane-dense axis
K_RAW = CIN * K * K * K  # 27 (im2col contraction dim)
K_PAD = 32               # zero-padded contraction dim (nicer TPU layout)

# ---- packed parameter slab layout: one (8, 128) f32 tile, one DMA ---------------
SLAB_ROWS, SLAB_COLS = 8, 128
CW_COL = 0                     # [0:COUT, 0:K_PAD]        conv weights (COUT, K_PAD)
CB_COL = 32                    # [0:COUT, 32]             conv bias
WCONV_COL = 40                 # [0:NC,   40:48]          fc weights on pooled feats
WAGE_COL = 48                  # [0:NC,   48]             fc weight on age
FB_COL = 49                    # [0:NC,   49]             fc bias
AGE_COL = 56                   # [0,      56:56+B]        per-call age row
LABEL_COL = 64                 # [0,      64:64+B]        per-call label row (as f32)

_VMEM = pl.BlockSpec(memory_space=pltpu.MemorySpace.VMEM)


# ------------------------------- fused Pallas kernel ------------------------------
def _fused_kernel(compute_loss, patches_ref, params_ref, out_ref):
    # patches: (K_PAD, B*V) bf16   params: (8, 128) f32   out: (8, 128) f32
    slab = params_ref[...]                                        # one full-tile load
    cw = slab[:, CW_COL:CW_COL + K_PAD].astype(jnp.bfloat16)      # (COUT, K_PAD)
    cb = slab[:, CB_COL:CB_COL + 1]                               # (COUT, 1)
    wconv = slab[:NUM_CLASSES, WCONV_COL:WCONV_COL + COUT]        # (NC, COUT)
    wage = slab[:NUM_CLASSES, WAGE_COL:WAGE_COL + 1]              # (NC, 1)
    fb = slab[:NUM_CLASSES, FB_COL:FB_COL + 1]                    # (NC, 1)
    age = slab[0:1, AGE_COL:AGE_COL + B]                          # (1, B)

    # Conv as one lane-dense bf16 MXU matmul with f32 accumulation:
    # (COUT, K_PAD) @ (K_PAD, B*V) -> (COUT, B*V)
    h = jnp.dot(cw, patches_ref[...], preferred_element_type=jnp.float32)
    h = jnp.maximum(h + cb, 0.0)                                  # bias + ReLU (f32)

    # Global average pool: lane-dense (B, B*V) averaging mask built in-kernel from
    # iotas (no HBM operand), contracted on the MXU via NT dot_general.
    row = jax.lax.broadcasted_iota(jnp.int32, (B, BV), 0)         # batch id per row
    col = jax.lax.broadcasted_iota(jnp.int32, (B, BV), 1)         # voxel column id
    lower = row * V
    pool = ((col >= lower) & (col < lower + V)).astype(jnp.float32) * (1.0 / V)
    pooled_t = jax.lax.dot_general(h, pool, (((1,), (1,)), ((), ())),
                                   preferred_element_type=jnp.float32)  # (COUT, B)

    # Classifier, class-major layout: (NC, COUT) @ (COUT, B) + age term + bias
    logits_t = (jnp.dot(wconv, pooled_t, preferred_element_type=jnp.float32)
                + wage * age + fb)                                # (NC, B)

    # Single lane-dense (8, 128) output slab -> one output DMA.
    out_ref[...] = jnp.zeros((SLAB_ROWS, SLAB_COLS), jnp.float32)
    out_ref[0:NUM_CLASSES, 0:B] = logits_t

    if compute_loss:
        # Cross-entropy (mean over batch) == nn.CrossEntropyLoss(logits, label).
        label_i = slab[0:1, LABEL_COL:LABEL_COL + B].astype(jnp.int32)   # (1, B)
        m = jnp.max(logits_t, axis=0, keepdims=True)                     # (1, B)
        lse = m + jnp.log(jnp.sum(jnp.exp(logits_t - m), axis=0, keepdims=True))
        cls = jax.lax.broadcasted_iota(jnp.int32, (NUM_CLASSES, B), 0)
        onehot = (cls == label_i).astype(jnp.float32)                    # (NC, B)
        picked = jnp.sum(onehot * logits_t, axis=0, keepdims=True)
        nll = lse - picked                                               # (1, B)
        out_ref[NUM_CLASSES:NUM_CLASSES + 1, 0:1] = (
            jnp.sum(nll, axis=1, keepdims=True) * (1.0 / B))


def _fused_call(patches, slab, compute_loss):
    return pl.pallas_call(
        functools.partial(_fused_kernel, compute_loss),
        out_shape=jax.ShapeDtypeStruct((SLAB_ROWS, SLAB_COLS), jnp.float32),
        in_specs=[_VMEM, _VMEM],
        out_specs=_VMEM,
    )(patches, slab)


# ------------------------------- glue (jitted JAX) ---------------------------------
def _im2col_3d_t(x):
    """x: (B, CIN, D, H, W) -> patches_T (K_PAD, B*V) bf16; padding=1, stride=1.

    Row order (cin, kd, kh, kw) matches conv_w.reshape(COUT, K_RAW); column order
    is batch-major then (d, h, w), matching the in-kernel block-averaging mask.
    """
    xp = jnp.pad(x.astype(jnp.float32), ((0, 0), (0, 0), (1, 1), (1, 1), (1, 1)))
    rows = []
    for c in range(CIN):
        for kd in range(K):
            for kh in range(K):
                for kw in range(K):
                    rows.append(xp[:, c, kd:kd + D, kh:kh + H, kw:kw + W].reshape(BV))
    p = jnp.stack(rows, axis=0)                          # (K_RAW, B*V)
    p = jnp.pad(p, ((0, K_PAD - K_RAW), (0, 0)))         # (K_PAD, B*V)
    return p.astype(jnp.bfloat16)                        # halve the dominant stream


@jax.jit
def _forward_with_loss(base_slab, image, age_row, label_row):
    patches = _im2col_3d_t(image)
    slab = jax.lax.dynamic_update_slice(base_slab, age_row, (0, AGE_COL))
    slab = jax.lax.dynamic_update_slice(slab, label_row, (0, LABEL_COL))
    out = _fused_call(patches, slab, compute_loss=True)
    return out[:NUM_CLASSES, :B].T, out[NUM_CLASSES, 0]


@jax.jit
def _forward_no_loss(base_slab, image, age_row):
    patches = _im2col_3d_t(image)
    slab = jax.lax.dynamic_update_slice(base_slab, age_row, (0, AGE_COL))
    out = _fused_call(patches, slab, compute_loss=False)
    return out[:NUM_CLASSES, :B].T


class WrappedModelPallas:
    """JAX/Pallas equivalent of WrappedModel(base=AD3DCNN, loss_fn=CrossEntropyLoss)."""

    def __init__(self, key):
        k1, k2, k3, k4 = jax.random.split(key, 4)
        # deterministic synthetic params (torch layout: conv (Cout,Cin,k,k,k), fc (out,in))
        conv_w = 0.1 * jax.random.normal(k1, (COUT, CIN, K, K, K), jnp.float32)
        conv_b = 0.1 * jax.random.normal(k2, (COUT,), jnp.float32)
        fc_w = 0.1 * jax.random.normal(k3, (NUM_CLASSES, COUT + 1), jnp.float32)
        fc_b = 0.1 * jax.random.normal(k4, (NUM_CLASSES,), jnp.float32)
        # Pack everything into one (8, 128) f32 VMEM slab (one DMA into the kernel).
        cw = jnp.pad(conv_w.reshape(COUT, K_RAW), ((0, 0), (0, K_PAD - K_RAW)))
        slab = jnp.zeros((SLAB_ROWS, SLAB_COLS), jnp.float32)
        slab = slab.at[:COUT, CW_COL:CW_COL + K_PAD].set(cw)
        slab = slab.at[:COUT, CB_COL:CB_COL + 1].set(conv_b.reshape(COUT, 1))
        slab = slab.at[:NUM_CLASSES, WCONV_COL:WCONV_COL + COUT].set(fc_w[:, :COUT])
        slab = slab.at[:NUM_CLASSES, WAGE_COL:WAGE_COL + 1].set(fc_w[:, COUT:COUT + 1])
        slab = slab.at[:NUM_CLASSES, FB_COL:FB_COL + 1].set(fc_b.reshape(NUM_CLASSES, 1))
        self.base_slab = slab

    def forward(self, image, label=None, age=None, **kwargs):
        if age is not None:
            age_row = jnp.asarray(age, jnp.float32).reshape(1, B)
        else:
            # TODO(synk): age=None is treated as a zero age contribution; the
            # original base(image) no-age path may differ if AD3DCNN drops the
            # age feature entirely.
            age_row = jnp.zeros((1, B), jnp.float32)

        if label is not None:
            label_row = jnp.asarray(label, jnp.float32).reshape(1, B)
            logits, loss = _forward_with_loss(self.base_slab, image, age_row, label_row)
            return {'logits': logits, 'loss': loss}

        logits = _forward_no_loss(self.base_slab, image, age_row)
        return {'logits': logits}


# ---------------------------------------- main ------------------------------------
if __name__ == "__main__":
    key = jax.random.PRNGKey(0)
    kimg, kage, klbl, kparam = jax.random.split(key, 4)
    image = jax.random.normal(kimg, (B, CIN, D, H, W), jnp.float32)   # NCDHW
    age = jax.random.uniform(kage, (B,), jnp.float32, 50.0, 90.0)
    label = jax.random.randint(klbl, (B,), 0, NUM_CLASSES)

    model = WrappedModelPallas(kparam)
    out = model.forward(image, label=label, age=age)
    jax.block_until_ready(out['logits'])
    jax.block_until_ready(out['loss'])
    assert out['logits'].shape == (B, NUM_CLASSES)
    assert out['loss'].shape == ()

    # logits-only path (label=None), mirroring WrappedModel.forward without a label
    out2 = model.forward(image, age=age)
    jax.block_until_ready(out2['logits'])
    assert out2['logits'].shape == (B, NUM_CLASSES)

    print("KERNEL_OK")
</pallas_src>

<mosaic_0001>
module attributes {stable_mosaic.version = 11 : i64} {
  func.func @_fused_kernel(%arg0: memref<32x1024xbf16, #tpu.memory_space<vmem>>, %arg1: memref<8x128xf32, #tpu.memory_space<vmem>>, %arg2: memref<8x128xf32, #tpu.memory_space<vmem>>) attributes {dimension_semantics = [], scalar_prefetch = 0 : i64, scratch_operands = 0 : i64, tpu.core_type = #tpu.core_type<tc>} {
    %c0 = arith.constant 0 : index
    %c0_0 = arith.constant 0 : index
    %0 = vector.load %arg1[%c0, %c0_0] : memref<8x128xf32, #tpu.memory_space<vmem>>, vector<8x128xf32>
    %1 = vector.extract_strided_slice %0 {offsets = [0, 0], sizes = [8, 32], strides = [1, 1]} : vector<8x128xf32> to vector<8x32xf32>
    %2 = arith.truncf %1 : vector<8x32xf32> to vector<8x32xbf16>
    %3 = vector.extract_strided_slice %0 {offsets = [0, 32], sizes = [8, 1], strides = [1, 1]} : vector<8x128xf32> to vector<8x1xf32>
    %4 = vector.extract_strided_slice %0 {offsets = [0, 40], sizes = [2, 8], strides = [1, 1]} : vector<8x128xf32> to vector<2x8xf32>
    %5 = vector.extract_strided_slice %0 {offsets = [0, 48], sizes = [2, 1], strides = [1, 1]} : vector<8x128xf32> to vector<2x1xf32>
    %6 = vector.extract_strided_slice %0 {offsets = [0, 49], sizes = [2, 1], strides = [1, 1]} : vector<8x128xf32> to vector<2x1xf32>
    %7 = vector.extract_strided_slice %0 {offsets = [0, 56], sizes = [1, 2], strides = [1, 1]} : vector<8x128xf32> to vector<1x2xf32>
    %c0_1 = arith.constant 0 : index
    %c0_2 = arith.constant 0 : index
    %8 = vector.load %arg0[%c0_1, %c0_2] : memref<32x1024xbf16, #tpu.memory_space<vmem>>, vector<32x1024xbf16>
    %cst = arith.constant dense<0.000000e+00> : vector<8x1024xf32>
    %9 = tpu.matmul %2, %8, %cst {dimension_numbers = #tpu.dot_dimension_numbers<[1], [0], [0], [1], [0, 0, 1, 1], [], []>} : vector<8x32xbf16>, vector<32x1024xbf16>, vector<8x1024xf32> -> vector<8x1024xf32>
    %10 = vector.broadcast %3 : vector<8x1xf32> to vector<8x1024xf32>
    %11 = arith.addf %9, %10 : vector<8x1024xf32>
    %cst_3 = arith.constant 0.000000e+00 : f32
    %12 = vector.broadcast %cst_3 : f32 to vector<8x1024xf32>
    %13 = arith.maximumf %11, %12 : vector<8x1024xf32>
    %14 = tpu.iota {dimensions = array<i32: 0>} : vector<2x1024xi32>
    %15 = tpu.iota {dimensions = array<i32: 1>} : vector<2x1024xi32>
    %c512_i32 = arith.constant 512 : i32
    %16 = vector.broadcast %c512_i32 : i32 to vector<2x1024xi32>
    %17 = arith.muli %14, %16 : vector<2x1024xi32>
    %18 = arith.cmpi sge, %15, %17 : vector<2x1024xi32>
    %c512_i32_4 = arith.constant 512 : i32
    %19 = vector.broadcast %c512_i32_4 : i32 to vector<2x1024xi32>
    %20 = arith.addi %17, %19 : vector<2x1024xi32>
    %21 = arith.cmpi slt, %15, %20 : vector<2x1024xi32>
    %22 = arith.andi %18, %21 : vector<2x1024xi1>
    %23 = arith.extui %22 : vector<2x1024xi1> to vector<2x1024xi32>
    %24 = arith.sitofp %23 : vector<2x1024xi32> to vector<2x1024xf32>
    %cst_5 = arith.constant 0.001953125 : f32
    %25 = vector.broadcast %cst_5 : f32 to vector<2x1024xf32>
    %26 = arith.mulf %24, %25 : vector<2x1024xf32>
    %cst_6 = arith.constant dense<0.000000e+00> : vector<8x2xf32>
    %27 = tpu.matmul %13, %26, %cst_6 {dimension_numbers = #tpu.dot_dimension_numbers<[1], [1], [0], [0], [0, 0, 1, 0], [], []>} : vector<8x1024xf32>, vector<2x1024xf32>, vector<8x2xf32> -> vector<8x2xf32>
    %cst_7 = arith.constant dense<0.000000e+00> : vector<2x2xf32>
    %28 = tpu.matmul %4, %27, %cst_7 {dimension_numbers = #tpu.dot_dimension_numbers<[1], [0], [0], [1], [0, 0, 1, 1], [], []>} : vector<2x8xf32>, vector<8x2xf32>, vector<2x2xf32> -> vector<2x2xf32>
    %29 = vector.broadcast %5 : vector<2x1xf32> to vector<2x2xf32>
    %30 = vector.broadcast %7 : vector<1x2xf32> to vector<2x2xf32>
    %31 = arith.mulf %29, %30 : vector<2x2xf32>
    %32 = arith.addf %28, %31 : vector<2x2xf32>
    %33 = vector.broadcast %6 : vector<2x1xf32> to vector<2x2xf32>
    %34 = arith.addf %32, %33 : vector<2x2xf32>
    %cst_8 = arith.constant 0.000000e+00 : f32
    %35 = vector.broadcast %cst_8 : f32 to vector<8x128xf32>
    %c0_9 = arith.constant 0 : index
    %c0_10 = arith.constant 0 : index
    %36 = vector.load %arg2[%c0_9, %c0_10] : memref<8x128xf32, #tpu.memory_space<vmem>>, vector<8x128xf32>
    tpu.vector_store %arg2[%c0_9, %c0_10], %35 {strides = array<i32>} : memref<8x128xf32, #tpu.memory_space<vmem>>, vector<8x128xf32>,
    %c0_11 = arith.constant 0 : index
    %c0_12 = arith.constant 0 : index
    %37 = vector.load %arg2[%c0_11, %c0_12] : memref<8x128xf32, #tpu.memory_space<vmem>>, vector<2x2xf32>
    tpu.vector_store %arg2[%c0_11, %c0_12], %34 {strides = array<i32>} : memref<8x128xf32, #tpu.memory_space<vmem>>, vector<2x2xf32>,
    %38 = vector.extract_strided_slice %0 {offsets = [0, 64], sizes = [1, 2], strides = [1, 1]} : vector<8x128xf32> to vector<1x2xf32>
    %39 = arith.fptosi %38 : vector<1x2xf32> to vector<1x2xi32>
    %cst_13 = arith.constant dense<0xFF800000> : vector<2xf32>
    %40 = vector.multi_reduction <maximumf>, %34, %cst_13 [0] : vector<2x2xf32> to vector<2xf32>
    %41 = vector.shape_cast %40 : vector<2xf32> to vector<1x2xf32>
    %42 = vector.broadcast %41 : vector<1x2xf32> to vector<2x2xf32>
    %43 = arith.subf %34, %42 : vector<2x2xf32>
    %44 = math.exp %43 : vector<2x2xf32>
    %cst_14 = arith.constant dense<0.000000e+00> : vector<2xf32>
    %45 = vector.multi_reduction <add>, %44, %cst_14 [0] : vector<2x2xf32> to vector<2xf32>
    %46 = vector.shape_cast %45 : vector<2xf32> to vector<1x2xf32>
    %47 = math.log %46 : vector<1x2xf32>
    %48 = arith.addf %41, %47 : vector<1x2xf32>
    %49 = tpu.iota {dimensions = array<i32: 0>} : vector<2x2xi32>
    %50 = vector.broadcast %39 : vector<1x2xi32> to vector<2x2xi32>
    %51 = arith.cmpi eq, %49, %50 : vector<2x2xi32>
    %52 = arith.extui %51 : vector<2x2xi1> to vector<2x2xi32>
    %53 = arith.sitofp %52 : vector<2x2xi32> to vector<2x2xf32>
    %54 = arith.mulf %53, %34 : vector<2x2xf32>
    %cst_15 = arith.constant dense<0.000000e+00> : vector<2xf32>
    %55 = vector.multi_reduction <add>, %54, %cst_15 [0] : vector<2x2xf32> to vector<2xf32>
    %56 = vector.shape_cast %55 : vector<2xf32> to vector<1x2xf32>
    %57 = arith.subf %48, %56 : vector<1x2xf32>
    %cst_16 = arith.constant dense<0.000000e+00> : vector<1xf32>
    %58 = vector.multi_reduction <add>, %57, %cst_16 [1] : vector<1x2xf32> to vector<1xf32>
    %59 = vector.shape_cast %58 : vector<1xf32> to vector<1x1xf32>
    %cst_17 = arith.constant 5.000000e-01 : f32
    %60 = vector.broadcast %cst_17 : f32 to vector<1x1xf32>
    %61 = arith.mulf %59, %60 : vector<1x1xf32>
    %c2 = arith.constant 2 : index
    %c0_18 = arith.constant 0 : index
    %62 = vector.load %arg2[%c2, %c0_18] : memref<8x128xf32, #tpu.memory_space<vmem>>, vector<1x1xf32>
    tpu.vector_store %arg2[%c2, %c0_18], %61 {strides = array<i32>} : memref<8x128xf32, #tpu.memory_space<vmem>>, vector<1x1xf32>,
    return
  }
}

</mosaic_0001>

<bundles_post_ra>
// kernel: squeeze.0
= control target key start
LH: loop header
LB: loop body
LE: loop exit
PB: predicated region body
PF: predicated region fallthrough
CT: control target
= control target key end

     0   :  { %s816_s18 = smov 3  ;;  %s818_s19 = smov 12  ;;  %vm261_vm0 = vcmask 1043458   ;;  %vm265_vm1 = vcmask 1045508   ;;  %vm269_vm2 = vcmask 1047558   ;;  %vm271_vm3 = vcmask 64512   ;;  %s927_s0 = inlined_call_operand.vmem [shape: bf16[2,1,8,8,8], index: 0, kind: input, shape index: {}]   ;;  %s928_s1 = inlined_call_operand.vmem [shape: bf16[1,1024], index: 1, kind: output, shape index: {}]  }
   0x1   :  { %v749_v0 = vld [vmem:[%s927_s0 + $0x38] sm:$0xff]   ;;  %v750_v1 = vld [vmem:[%s927_s0 + $0x30] sm:$0xff]   ;;  %v751_v2 = vld [vmem:[%s927_s0 + $0x28] sm:$0xff]   ;;  %s828_s24 = smov 192  ;;  %s830_s25 = smov 3  ;;  %vm294_vm4 = vcmask 1048512  }
   0x2   :  { %v720_v3 = vunpack.c.h.bf16 %v749_v0  ;;  %v724_v4 = vunpack.c.h.bf16 %v750_v1  ;;  %v728_v5 = vunpack.c.h.bf16 %v751_v2  ;;  %v752_v6 = vld [vmem:[%s927_s0 + $0x20] sm:$0xff]   ;;  %v753_v7 = vld [vmem:[%s927_s0 + $0x18] sm:$0xff]   ;;  %v754_v8 = vld [vmem:[%s927_s0 + $0x10] sm:$0xff]   ;;  %v719_v9 = vunpack.c.l.bf16 %v749_v0  ;;  %s832_s26 = smov 12  ;;  %s834_s27 = smov 48 }
   0x3   :  { %v732_v10 = vunpack.c.h.bf16 %v752_v6  ;;  %v736_v11 = vunpack.c.h.bf16 %v753_v7  ;;  %v740_v12 = vunpack.c.h.bf16 %v754_v8  ;;  %v755_v13 = vld [vmem:[%s927_s0 + $0x8] sm:$0xff]   ;;  %v746_v14 = vld [vmem:[%s927_s0] sm:$0xff]   ;;  %s826_s0 = smov 48  ;;  %v723_v15 = vunpack.c.l.bf16 %v750_v1  ;;  %s836_s28 = smov 192 }
   0x4   :  { %20 = vst [vmem:[#allocation1 + $0x78] sm:$0xff] %v720_v3  ;;  %52 = vst [vmem:[#allocation1 + $0x68] sm:$0xff] %v724_v4  ;;  %v744_v16 = vunpack.c.h.bf16 %v755_v13  ;;  %v748_v17 = vunpack.c.h.bf16 %v746_v14  ;;  %v727_v18 = vunpack.c.l.bf16 %v751_v2  ;;  %v731_v19 = vunpack.c.l.bf16 %v752_v6  ;;  %s298_s29 = smov 3  ;;  %s301_s30 = smov 12 }
   0x5   :  { %84 = vst [vmem:[#allocation1 + $0x58] sm:$0xff] %v728_v5  ;;  %36 = vst [vmem:[#allocation1 + $0x70] sm:$0xff] %v719_v9  ;;  %v735_v20 = vunpack.c.l.bf16 %v753_v7  ;;  %v739_v21 = vunpack.c.l.bf16 %v754_v8  ;;  %v743_v22 = vunpack.c.l.bf16 %v755_v13  ;;  %v747_v23 = vunpack.c.l.bf16 %v746_v14  ;;  %s306_s2 = smov 48  ;;  %s311_s3 = smov 192 }
   0x6   :  { %116 = vst [vmem:[#allocation1 + $0x48] sm:$0xff] %v732_v10  ;;  %148 = vst [vmem:[#allocation1 + $0x38] sm:$0xff] %v736_v11  ;;  %s344_s4 = smov 3  ;;  %s347_s5 = smov 12  ;;  %vm317_vm5 = vcmask 982912   ;;  %vm340_vm6 = vcmask 917312  }
   0x7   :  { %180 = vst [vmem:[#allocation1 + $0x28] sm:$0xff] %v740_v12  ;;  %68 = vst [vmem:[#allocation1 + $0x60] sm:$0xff] %v723_v15  ;;  %s352_s6 = smov 48  ;;  %s838_s7 = smov 192  ;;  %vm363_vm7 = vcmask 851712   ;;  %vm386_vm8 = vcmask 786112  }
   0x8   :  { %212 = vst [vmem:[#allocation1 + $0x18] sm:$0xff] %v744_v16  ;;  %243 = vst [vmem:[#allocation1 + $0x8] sm:$0xff] %v748_v17  ;;  %s840_s8 = smov 3  ;;  %s842_s9 = smov 12  ;;  %vm409_vm9 = vcmask 720512   ;;  %vm432_vm10 = vcmask 654912  }
   0x9   :  { %100 = vst [vmem:[#allocation1 + $0x50] sm:$0xff] %v727_v18  ;;  %132 = vst [vmem:[#allocation1 + $0x40] sm:$0xff] %v731_v19  ;;  %s772_s10 = smov 120   ;;  %s773_s11 = smov 104   ;;  %vm455_vm11 = vcmask 589312   ;;  %vm478_vm12 = vcmask 523712  }
   0xa   :  { %164 = vst [vmem:[#allocation1 + $0x30] sm:$0xff] %v735_v20  ;;  %196 = vst [vmem:[#allocation1 + $0x20] sm:$0xff] %v739_v21  ;;  %s375_s12 = smov 48  ;;  %s380_s13 = smov 192  ;;  %vm501_vm13 = vcmask 458112   ;;  %vm524_vm14 = vcmask 392512  }
   0xb   :  { %228 = vst [vmem:[#allocation1 + $0x10] sm:$0xff] %v743_v22  ;;  %256 = vst [vmem:[#allocation1] sm:$0xff] %v747_v23  ;;  %s390_s14 = smov 3  ;;  %s774_s15 = smov 112   ;;  %vm547_vm15 = vcmask 326912  }
   0xc   :  { %s393_s16 = smov 12  ;;  %s398_s17 = smov 48 }
   0xd   :  { %s413_s20 = smov 3  ;;  %s416_s21 = smov 12 }
   0xe   :  { %s421_s22 = smov 48  ;;  %s426_s23 = smov 192 }
   0xf   :  { %v276_v24 = vld [vmem:[#allocation1 + $0xf] ss:$16 sm:%s816_s18]   ;;  %v322_v29 = vld [vmem:[#allocation1 + $0xd] ss:$16 sm:%s830_s25]   ;;  %v299_v35 = vld [vmem:[#allocation1 + $0xe] ss:$16 sm:%s298_s29]  }
  0x10   :  { %v279_v25 = vld [vmem:[#allocation1 + $0xf] ss:$16 sm:%s818_s19]   ;;  %v325_v30 = vld [vmem:[#allocation1 + $0xd] ss:$16 sm:%s832_s26]   ;;  %v302_v38 = vld [vmem:[#allocation1 + $0xe] ss:$16 sm:%s301_s30]  }
  0x11   :  { %v284_v26 = vld [vmem:[#allocation1 + $0xf] ss:$16 sm:%s826_s0]   ;;  %v281_v27 = vsel %vm261_vm0, %v279_v25, %v276_v24  ;;  %v327_v32 = vsel %vm261_vm0, %v325_v30, %v322_v29  ;;  %v330_v33 = vld [vmem:[#allocation1 + $0xd] ss:$16 sm:%s834_s27]   ;;  %v307_v39 = vld [vmem:[#allocation1 + $0xe] ss:$16 sm:%s306_s2]   ;;  %v304_v42 = vsel %vm261_vm0, %v302_v38, %v299_v35 }
  0x12   :  { %v289_v28 = vld [vmem:[#allocation1 + $0xf] ss:$16 sm:%s828_s24]   ;;  %v286_v31 = vsel %vm265_vm1, %v284_v26, %v281_v27  ;;  %v335_v34 = vld [vmem:[#allocation1 + $0xd] ss:$16 sm:%s836_s28]   ;;  %v332_v37 = vsel %vm265_vm1, %v330_v33, %v327_v32  ;;  %v312_v40 = vld [vmem:[#allocation1 + $0xe] ss:$16 sm:%s311_s3]   ;;  %v309_v46 = vsel %vm265_vm1, %v307_v39, %v304_v42 }
  0x13   :  { %v291_v36 = vsel %vm269_vm2, %v289_v28, %v286_v31  ;;  %v337_v41 = vsel %vm269_vm2, %v335_v34, %v332_v37  ;;  %v345_v43 = vld [vmem:[#allocation1 + $0xc] ss:$16 sm:%s344_s4]   ;;  %v368_v49 = vld [vmem:[#allocation1 + $0xb] ss:$16 sm:%s840_s8]   ;;  %v314_v51 = vsel %vm269_vm2, %v312_v40, %v309_v46  ;;  %v391_v58 = vld [vmem:[#allocation1 + $0xa] ss:$16 sm:%s390_s14]  }
  0x14   :  { %292 = vrot.lane.b32.xlu0 %v291_v36, %s772_s10  ;;  %v348_v44 = vld [vmem:[#allocation1 + $0xc] ss:$16 sm:%s347_s5]   ;;  %338 = vrot.lane.b32.xlu1 %v337_v41, %s773_s11  ;;  %v371_v50 = vld [vmem:[#allocation1 + $0xb] ss:$16 sm:%s842_s9]   ;;  %s775_s18 = smov 96   ;;  %s403_s19 = smov 192 }
  0x15   :  { %v353_v45 = vld [vmem:[#allocation1 + $0xc] ss:$16 sm:%s352_s6]   ;;  %v350_v47 = vsel %vm261_vm0, %v348_v44, %v345_v43  ;;  %v373_v53 = vsel %vm261_vm0, %v371_v50, %v368_v49  ;;  %v376_v55 = vld [vmem:[#allocation1 + $0xb] ss:$16 sm:%s375_s12]   ;;  %v394_v60 = vld [vmem:[#allocation1 + $0xa] ss:$16 sm:%s393_s16]  }
  0x16   :  { %v358_v48 = vld [vmem:[#allocation1 + $0xc] ss:$16 sm:%s838_s7]   ;;  %v355_v52 = vsel %vm265_vm1, %v353_v45, %v350_v47  ;;  %v381_v56 = vld [vmem:[#allocation1 + $0xb] ss:$16 sm:%s380_s13]   ;;  %v378_v57 = vsel %vm265_vm1, %v376_v55, %v373_v53  ;;  %v399_v61 = vld [vmem:[#allocation1 + $0xa] ss:$16 sm:%s398_s17]   ;;  %v396_v62 = vsel %vm261_vm0, %v394_v60, %v391_v58 }
  0x17   :  { %v360_v54 = vsel %vm269_vm2, %v358_v48, %v355_v52  ;;  %v383_v59 = vsel %vm269_vm2, %v381_v56, %v378_v57  ;;  %v404_v63 = vld [vmem:[#allocation1 + $0xa] ss:$16 sm:%s403_s19]   ;;  %v401_v0 = vsel %vm265_vm1, %v399_v61, %v396_v62  ;;  %v414_v1 = vld [vmem:[#allocation1 + $0x9] ss:$16 sm:%s413_s20]   ;;  %s776_s0 = smov 88   ;;  %s436_s24 = smov 3 }
  0x18   :  { %315 = vrot.lane.b32.xlu0 %v314_v51, %s774_s15  ;;  %361 = vrot.lane.b32.xlu1 %v360_v54, %s775_s18  ;;  %v417_v2 = vld [vmem:[#allocation1 + $0x9] ss:$16 sm:%s416_s21]   ;;  %v406_v3 = vsel %vm269_vm2, %v404_v63, %v401_v0  ;;  %s777_s25 = smov 80   ;;  %v437_v8 = vld [vmem:[#allocation1 + $0x8] ss:$16 sm:%s436_s24]   ;;  %s439_s26 = smov 12 }
  0x19   :  { %v419_v4 = vsel %vm261_vm0, %v417_v2, %v414_v1  ;;  %v422_v5 = vld [vmem:[#allocation1 + $0x9] ss:$16 sm:%s421_s22]   ;;  %s444_s27 = smov 48  ;;  %v440_v10 = vld [vmem:[#allocation1 + $0x8] ss:$16 sm:%s439_s26]   ;;  %s449_s28 = smov 192 }
  0x1a   :  { %v427_v6 = vld [vmem:[#allocation1 + $0x9] ss:$16 sm:%s426_s23]   ;;  %v424_v7 = vsel %vm265_vm1, %v422_v5, %v419_v4  ;;  %v445_v11 = vld [vmem:[#allocation1 + $0x8] ss:$16 sm:%s444_s27]   ;;  %v442_v12 = vsel %vm261_vm0, %v440_v10, %v437_v8  ;;  %s459_s29 = smov 3  ;;  %s462_s30 = smov 12 }
  0x1b   :  { %v429_v9 = vsel %vm269_vm2, %v427_v6, %v424_v7  ;;  %v450_v13 = vld [vmem:[#allocation1 + $0x8] ss:$16 sm:%s449_s28]   ;;  %s778_s2 = smov 72   ;;  %v447_v14 = vsel %vm265_vm1, %v445_v11, %v442_v12  ;;  %v460_v15 = vld [vmem:[#allocation1 + $0x7] ss:$16 sm:%s459_s29]   ;;  %s467_s3 = smov 48 }
  0x1c   :  { %384 = vrot.lane.b32.xlu0 %v383_v59, %s776_s0  ;;  %407 = vrot.lane.b32.xlu1 %v406_v3, %s777_s25  ;;  %v463_v16 = vld [vmem:[#allocation1 + $0x7] ss:$16 sm:%s462_s30]   ;;  %s472_s4 = smov 192  ;;  %v452_v17 = vsel %vm269_vm2, %v450_v13, %v447_v14  ;;  %s482_s5 = smov 3 }
  0x1d   :  { %v465_v18 = vsel %vm261_vm0, %v463_v16, %v460_v15  ;;  %v468_v19 = vld [vmem:[#allocation1 + $0x7] ss:$16 sm:%s467_s3]   ;;  %s779_s6 = smov 64   ;;  %v483_v22 = vld [vmem:[#allocation1 + $0x6] ss:$16 sm:%s482_s5]   ;;  %s485_s7 = smov 12 }
  0x1e   :  { %v473_v20 = vld [vmem:[#allocation1 + $0x7] ss:$16 sm:%s472_s4]   ;;  %v470_v21 = vsel %vm265_vm1, %v468_v19, %v465_v18  ;;  %s490_s8 = smov 48  ;;  %v486_v24 = vld [vmem:[#allocation1 + $0x6] ss:$16 sm:%s485_s7]   ;;  %s495_s9 = smov 192 }
  0x1f   :  { %v475_v23 = vsel %vm269_vm2, %v473_v20, %v470_v21  ;;  %v491_v25 = vld [vmem:[#allocation1 + $0x6] ss:$16 sm:%s490_s8]   ;;  %s780_s10 = smov 56   ;;  %v488_v26 = vsel %vm261_vm0, %v486_v24, %v483_v22  ;;  %s505_s11 = smov 3 }
  0x20   :  { %430 = vrot.lane.b32.xlu0 %v429_v9, %s778_s2  ;;  %453 = vrot.lane.b32.xlu1 %v452_v17, %s779_s6  ;;  %v496_v27 = vld [vmem:[#allocation1 + $0x6] ss:$16 sm:%s495_s9]   ;;  %s508_s12 = smov 12  ;;  %v493_v28 = vsel %vm265_vm1, %v491_v25, %v488_v26  ;;  %v506_v29 = vld [vmem:[#allocation1 + $0x5] ss:$16 sm:%s505_s11]   ;;  %s513_s13 = smov 48 }
  0x21   :  { %v509_v30 = vld [vmem:[#allocation1 + $0x5] ss:$16 sm:%s508_s12]   ;;  %s518_s14 = smov 192  ;;  %v498_v31 = vsel %vm269_vm2, %v496_v27, %v493_v28  ;;  %s528_s15 = smov 3  ;;  %v787_v26 = vmov 0.0  }
  0x22   :  { %v511_v32 = vsel %vm261_vm0, %v509_v30, %v506_v29  ;;  %v514_v33 = vld [vmem:[#allocation1 + $0x5] ss:$16 sm:%s513_s13]   ;;  %s781_s16 = smov 48   ;;  %v529_v36 = vld [vmem:[#allocation1 + $0x4] ss:$16 sm:%s528_s15]   ;;  %s531_s17 = smov 12 }
  0x23   :  { %v519_v34 = vld [vmem:[#allocation1 + $0x5] ss:$16 sm:%s518_s14]   ;;  %v516_v35 = vsel %vm265_vm1, %v514_v33, %v511_v32  ;;  %s536_s18 = smov 48  ;;  %v532_v38 = vld [vmem:[#allocation1 + $0x4] ss:$16 sm:%s531_s17]   ;;  %s541_s19 = smov 192 }
  0x24   :  { %476 = vrot.lane.b32.xlu0 %v475_v23, %s780_s10  ;;  %499 = vrot.lane.b32.xlu1 %v498_v31, %s781_s16  ;;  %v521_v37 = vsel %vm269_vm2, %v519_v34, %v516_v35  ;;  %v537_v39 = vld [vmem:[#allocation1 + $0x4] ss:$16 sm:%s536_s18]   ;;  %s782_s20 = smov 40   ;;  %v534_v40 = vsel %vm261_vm0, %v532_v38, %v529_v36  ;;  %s551_s21 = smov 3 }
  0x25   :  { %v542_v41 = vld [vmem:[#allocation1 + $0x4] ss:$16 sm:%s541_s19]   ;;  %s554_s22 = smov 12  ;;  %v539_v42 = vsel %vm265_vm1, %v537_v39, %v534_v40  ;;  %v552_v43 = vld [vmem:[#allocation1 + $0x3] ss:$16 sm:%s551_s21]   ;;  %s559_s23 = smov 48 }
  0x26   :  { %v555_v44 = vld [vmem:[#allocation1 + $0x3] ss:$16 sm:%s554_s22]   ;;  %s564_s0 = smov 192  ;;  %v544_v45 = vsel %vm269_vm2, %v542_v41, %v539_v42  ;;  %s574_s24 = smov 3 }
  0x27   :  { %v557_v46 = vsel %vm261_vm0, %v555_v44, %v552_v43  ;;  %v560_v47 = vld [vmem:[#allocation1 + $0x3] ss:$16 sm:%s559_s23]   ;;  %s783_s25 = smov 32   ;;  %v575_v50 = vld [vmem:[#allocation1 + $0x2] ss:$16 sm:%s574_s24]   ;;  %s577_s26 = smov 12 }
  0x28   :  { %522 = vrot.lane.b32.xlu0 %v521_v37, %s782_s20  ;;  %v565_v48 = vld [vmem:[#allocation1 + $0x3] ss:$16 sm:%s564_s0]   ;;  %545 = vrot.lane.b32.xlu1 %v544_v45, %s783_s25  ;;  %v562_v49 = vsel %vm265_vm1, %v560_v47, %v557_v46  ;;  %s582_s27 = smov 48  ;;  %v578_v52 = vld [vmem:[#allocation1 + $0x2] ss:$16 sm:%s577_s26]   ;;  %s587_s28 = smov 192 }
  0x29   :  { %v567_v51 = vsel %vm269_vm2, %v565_v48, %v562_v49  ;;  %v583_v53 = vld [vmem:[#allocation1 + $0x2] ss:$16 sm:%s582_s27]   ;;  %s784_s29 = smov 24   ;;  %v580_v54 = vsel %vm261_vm0, %v578_v52, %v575_v50  ;;  %s597_s30 = smov 3 }
  0x2a   :  { %v588_v55 = vld [vmem:[#allocation1 + $0x2] ss:$16 sm:%s587_s28]   ;;  %s600_s2 = smov 12  ;;  %v585_v56 = vsel %vm265_vm1, %v583_v53, %v580_v54  ;;  %v598_v57 = vld [vmem:[#allocation1 + $0x1] ss:$16 sm:%s597_s30]   ;;  %s605_s3 = smov 48 }
  0x2b   :  { %v601_v58 = vld [vmem:[#allocation1 + $0x1] ss:$16 sm:%s600_s2]   ;;  %s610_s4 = smov 192  ;;  %v590_v59 = vsel %vm269_vm2, %v588_v55, %v585_v56  ;;  %s257_s5 = smov 3 }
  0x2c   :  { %568 = vrot.lane.b32.xlu0 %v567_v51, %s784_s29  ;;  %v603_v60 = vsel %vm261_vm0, %v601_v58, %v598_v57  ;;  %v606_v61 = vld [vmem:[#allocation1 + $0x1] ss:$16 sm:%s605_s3]   ;;  %s785_s6 = smov 16   ;;  %s259_s7 = smov 12  ;;  %v258_v0 = vld [vmem:[#allocation1] ss:$16 sm:%s257_s5]  }
  0x2d   :  { %v611_v62 = vld [vmem:[#allocation1 + $0x1] ss:$16 sm:%s610_s4]   ;;  %591 = vrot.lane.b32.xlu1 %v590_v59, %s785_s6  ;;  %v608_v63 = vsel %vm265_vm1, %v606_v61, %v603_v60  ;;  %s263_s8 = smov 48  ;;  %s267_s9 = smov 192  ;;  %v260_v2 = vld [vmem:[#allocation1] ss:$16 sm:%s259_s7]  }
  0x2e   :  { %v613_v1 = vsel %vm269_vm2, %v611_v62, %v608_v63  ;;  %v264_v3 = vld [vmem:[#allocation1] ss:$16 sm:%s263_s8]   ;;  %s786_s10 = smov 8   ;;  %v262_v4 = vsel %vm261_vm0, %v260_v2, %v258_v0  ;;  %vm570_vm0 = vcmask 261312  }
  0x2f   :  { %v268_v5 = vld [vmem:[#allocation1] ss:$16 sm:%s267_s9]   ;;  %v266_v6 = vsel %vm265_vm1, %v264_v3, %v262_v4  ;;  %vm593_vm1 = vcmask 195712  }
  0x30   :  { %614 = vrot.lane.b32.xlu0 %v613_v1, %s786_s10  ;;  %v270_v7 = vsel %vm269_vm2, %v268_v5, %v266_v6  ;;  %vm616_vm2 = vcmask 130112  }
  0x31   :  { %272 = vst.msk [vmem:[#allocation0] ss:$8 sm:$0xf] %vm271_vm3, %v270_v7   ;;  %273 = vst.msk [vmem:[#allocation0] ss:$8 sm:$0xf0] %vm271_vm3, %v270_v7  }
  0x86   :  { %v293_v8 = vpop.permute.xlu0 %292   ;;  %v339_v9 = vpop.permute.xlu1 %338  }
  0x87   :  { %295 = vst.msk [vmem:[#allocation0] ss:$8 sm:$0xf] %vm294_vm4, %v293_v8   ;;  %296 = vst.msk [vmem:[#allocation0] ss:$8 sm:$0xf0] %vm294_vm4, %v293_v8  }
  0x8a   :  { %v316_v10 = vpop.permute.xlu0 %315   ;;  %v362_v11 = vpop.permute.xlu1 %361  }
  0x8b   :  { %318 = vst.msk [vmem:[#allocation0] ss:$8 sm:$0xf] %vm317_vm5, %v316_v10   ;;  %319 = vst.msk [vmem:[#allocation0] ss:$8 sm:$0xf0] %vm317_vm5, %v316_v10  }
  0x8c   :  { %341 = vst.msk [vmem:[#allocation0] ss:$8 sm:$0xf] %vm340_vm6, %v339_v9   ;;  %342 = vst.msk [vmem:[#allocation0] ss:$8 sm:$0xf0] %vm340_vm6, %v339_v9  }
  0x8d   :  { %364 = vst.msk [vmem:[#allocation0] ss:$8 sm:$0xf] %vm363_vm7, %v362_v11   ;;  %365 = vst.msk [vmem:[#allocation0] ss:$8 sm:$0xf0] %vm363_vm7, %v362_v11  }
  0x8e   :  { %v385_v12 = vpop.permute.xlu0 %384   ;;  %v408_v13 = vpop.permute.xlu1 %407  }
  0x8f   :  { %387 = vst.msk [vmem:[#allocation0] ss:$8 sm:$0xf] %vm386_vm8, %v385_v12   ;;  %388 = vst.msk [vmem:[#allocation0] ss:$8 sm:$0xf0] %vm386_vm8, %v385_v12  }
  0x90   :  { %410 = vst.msk [vmem:[#allocation0] ss:$8 sm:$0xf] %vm409_vm9, %v408_v13   ;;  %411 = vst.msk [vmem:[#allocation0] ss:$8 sm:$0xf0] %vm409_vm9, %v408_v13  }
  0x92   :  { %v431_v14 = vpop.permute.xlu0 %430   ;;  %v454_v15 = vpop.permute.xlu1 %453  }
  0x93   :  { %433 = vst.msk [vmem:[#allocation0] ss:$8 sm:$0xf] %vm432_vm10, %v431_v14   ;;  %434 = vst.msk [vmem:[#allocation0] ss:$8 sm:$0xf0] %vm432_vm10, %v431_v14  }
  0x94   :  { %456 = vst.msk [vmem:[#allocation0] ss:$8 sm:$0xf] %vm455_vm11, %v454_v15   ;;  %457 = vst.msk [vmem:[#allocation0] ss:$8 sm:$0xf0] %vm455_vm11, %v454_v15  }
  0x96   :  { %v477_v16 = vpop.permute.xlu0 %476   ;;  %v500_v17 = vpop.permute.xlu1 %499  }
  0x97   :  { %479 = vst.msk [vmem:[#allocation0] ss:$8 sm:$0xf] %vm478_vm12, %v477_v16   ;;  %480 = vst.msk [vmem:[#allocation0] ss:$8 sm:$0xf0] %vm478_vm12, %v477_v16  }
  0x98   :  { %502 = vst.msk [vmem:[#allocation0] ss:$8 sm:$0xf] %vm501_vm13, %v500_v17   ;;  %503 = vst.msk [vmem:[#allocation0] ss:$8 sm:$0xf0] %vm501_vm13, %v500_v17  }
  0x9a   :  { %v523_v18 = vpop.permute.xlu0 %522   ;;  %v546_v19 = vpop.permute.xlu1 %545  }
  0x9b   :  { %525 = vst.msk [vmem:[#allocation0] ss:$8 sm:$0xf] %vm524_vm14, %v523_v18   ;;  %526 = vst.msk [vmem:[#allocation0] ss:$8 sm:$0xf0] %vm524_vm14, %v523_v18  }
  0x9c   :  { %548 = vst.msk [vmem:[#allocation0] ss:$8 sm:$0xf] %vm547_vm15, %v546_v19   ;;  %549 = vst.msk [vmem:[#allocation0] ss:$8 sm:$0xf0] %vm547_vm15, %v546_v19  }
  0x9e   :  { %v569_v20 = vpop.permute.xlu0 %568  }
  0x9f   :  { %571 = vst.msk [vmem:[#allocation0] ss:$8 sm:$0xf] %vm570_vm0, %v569_v20   ;;  %572 = vst.msk [vmem:[#allocation0] ss:$8 sm:$0xf0] %vm570_vm0, %v569_v20   ;;  %v592_v21 = vpop.permute.xlu1 %591  }
  0xa0   :  { %594 = vst.msk [vmem:[#allocation0] ss:$8 sm:$0xf] %vm593_vm1, %v592_v21   ;;  %595 = vst.msk [vmem:[#allocation0] ss:$8 sm:$0xf0] %vm593_vm1, %v592_v21  }
  0xa2   :  { %v615_v22 = vpop.permute.xlu0 %614  }
  0xa3   :  { %617 = vst.msk [vmem:[#allocation0] ss:$8 sm:$0xf] %vm616_vm2, %v615_v22   ;;  %618 = vst.msk [vmem:[#allocation0] ss:$8 sm:$0xf0] %vm616_vm2, %v615_v22  }
  0xaa   :  { %v623_v23 = vld [vmem:[#allocation0] sm:$0x3]  ;;  %v628_v24 = vld [vmem:[#allocation0 + $0x8] sm:$0x3]  ;;  %v634_v25 = vld [vmem:[#allocation0 + $0x10] sm:$0x3] }
  0xab   :  { %v624_v27 = vpack.c.bf16 %v787_v26, %v623_v23  ;;  %v629_v28 = vpack.c.bf16 %v787_v26, %v628_v24  ;;  %v635_v29 = vpack.c.bf16 %v787_v26, %v634_v25  ;;  %v641_v30 = vld [vmem:[#allocation0 + $0x18] sm:$0x3]  ;;  %v648_v31 = vld [vmem:[#allocation0 + $0x20] sm:$0x3]  ;;  %v655_v32 = vld [vmem:[#allocation0 + $0x28] sm:$0x3] }
  0xac   :  { %v642_v33 = vpack.c.bf16 %v787_v26, %v641_v30  ;;  %v649_v34 = vpack.c.bf16 %v787_v26, %v648_v31  ;;  %v656_v35 = vpack.c.bf16 %v787_v26, %v655_v32  ;;  %v662_v36 = vld [vmem:[#allocation0 + $0x30] sm:$0x3]  ;;  %v669_v37 = vld [vmem:[#allocation0 + $0x38] sm:$0x3] }
  0xad   :  { %626 = vst [vmem:[%s928_s1] sm:$0x1] %v624_v27  ;;  %710 = vst [vmem:[%s928_s1 + $0x1] sm:$0x1] %v629_v28  ;;  %v663_v38 = vpack.c.bf16 %v787_v26, %v662_v36  ;;  %v670_v39 = vpack.c.bf16 %v787_v26, %v669_v37 }
  0xae   :  { %711 = vst [vmem:[%s928_s1 + $0x2] sm:$0x1] %v635_v29  ;;  %712 = vst [vmem:[%s928_s1 + $0x3] sm:$0x1] %v642_v33 }
  0xaf   :  { %713 = vst [vmem:[%s928_s1 + $0x4] sm:$0x1] %v649_v34  ;;  %714 = vst [vmem:[%s928_s1 + $0x5] sm:$0x1] %v656_v35 }
  0xb0   :  { %715 = vst [vmem:[%s928_s1 + $0x6] sm:$0x1] %v663_v38  ;;  %716 = vst [vmem:[%s928_s1 + $0x7] sm:$0x1] %v670_v39 }

// kernel: _forward_with_loss.1
= control target key start
LH: loop header
LB: loop body
LE: loop exit
PB: predicated region body
PF: predicated region fallthrough
CT: control target
= control target key end

     0   :  { %v847_v3 = vmov 0   ;;  %v848_v9 = vmov 32   ;;  %vm115_vm0 = vcmask 261120   ;;  %v291_v36 = vlaneseq  ;;  %s854_s14 = smov 72   ;;  %s855_s19 = smov 64   ;;  %s997_s0 = inlined_call_operand.vmem [shape: bf16[32,1024], index: 0, kind: input, shape index: {}]   ;;  %s998_s1 = inlined_call_operand.vmem [shape: f32[8,128], index: 1, kind: input, shape index: {}]   ;;  %s999_s2 = inlined_call_operand.vmem [shape: f32[8,128], index: 2, kind: output, shape index: {}]  }
   0x1   :  { %v14_v0 = vld [vmem:[%s997_s0] sm:$0xff]  ;;  %v16_v2 = vld [vmem:[%s997_s0 + $0x10] sm:$0xff]  ;;  %151 = vmatprep.mubr.bf16.mxu1 %v847_v3  ;;  %233 = vmatprep.mubr.bf16.mxu0 %v847_v3  ;;  %v15_v17 = vld [vmem:[%s997_s0 + $0x8] sm:$0xff]  ;;  %v849_v42 = vmov 0.0   ;;  %v851_v60 = vmov 48  }
   0x2   :  { %v18_v1 = vld [vmem:[%s997_s0 + $0x20] sm:$0xff]  ;;  %v20_v5 = vld [vmem:[%s997_s0 + $0x30] sm:$0xff]  ;;  %839 = vset.pattern.permute.xlu0 %v848_v9  ;;  %v19_v18 = vld [vmem:[%s997_s0 + $0x28] sm:$0xff]  ;;  %v931_v37 = vshrl.u32 %v291_v36, 7  ;;  %v294_v38 = vand.u32 127, %v291_v36  ;;  %840 = vset.pattern.permute.xlu1 %v851_v60  ;;  %725 = vst [vmem:[%s999_s2] sm:$0xff] %v849_v42 }
   0x3   :  { %v786_v4 = vcombine.high %v14_v0, %v18_v1  ;;  %v785_v6 = vcombine.low %v14_v0, %v18_v1  ;;  %v22_v7 = vld [vmem:[%s997_s0 + $0x40] sm:$0xff]  ;;  %v790_v10 = vcombine.high %v16_v2, %v20_v5  ;;  %v789_v11 = vcombine.low %v16_v2, %v20_v5  ;;  %v24_v13 = vld [vmem:[%s997_s0 + $0x50] sm:$0xff]  ;;  %v23_v22 = vld [vmem:[%s997_s0 + $0x48] sm:$0xff] }
   0x4   :  { %v26_v8 = vld [vmem:[%s997_s0 + $0x60] sm:$0xff]  ;;  %v28_v14 = vld [vmem:[%s997_s0 + $0x70] sm:$0xff]  ;;  %v788_v21 = vcombine.high %v15_v17, %v19_v18  ;;  %v27_v23 = vld [vmem:[%s997_s0 + $0x68] sm:$0xff]  ;;  %v787_v25 = vcombine.low %v15_v17, %v19_v18  ;;  %v302_v39 = vmul.u32 512, %v931_v37  ;;  %v295_v40 = vadd.s32 128, %v294_v38 }
   0x5   :  { %v794_v12 = vcombine.high %v22_v7, %v26_v8  ;;  %v898_v15 = vld [vmem:[%s998_s1] sm:$0xff]  ;;  %119 = vmatprep.subr.bf16.mxu1 %v786_v4  ;;  %v798_v16 = vcombine.high %v24_v13, %v28_v14  ;;  %201 = vmatprep.subr.bf16.mxu0 %v790_v10  ;;  %v793_v19 = vcombine.low %v22_v7, %v26_v8  ;;  %v17_v27 = vld [vmem:[%s997_s0 + $0x18] sm:$0xff]  ;;  %v297_v47 = vadd.s32 384, %v294_v38 }
   0x6   :  { %32 = vperm.xlu0 %839, %v898_v15   ;;  %120 = vmatpush1.bf16.msra.mxu1 %v785_v6  ;;  %v797_v20 = vcombine.low %v24_v13, %v28_v14  ;;  %v13_v24 = vpack.c.bf16 %v898_v15, %v898_v15  ;;  %v796_v26 = vcombine.high %v23_v22, %v27_v23  ;;  %v21_v28 = vld [vmem:[%s997_s0 + $0x38] sm:$0xff]  ;;  %v311_v41 = vadd.s32 512, %v302_v39 }
   0x7   :  { %202 = vmatpush1.bf16.msra.mxu0 %v789_v11  ;;  %121 = vmatprep.subr.bf16.mxu1 %v794_v12  ;;  %v795_v29 = vcombine.low %v23_v22, %v27_v23  ;;  %v792_v30 = vcombine.high %v17_v27, %v21_v28  ;;  %v25_v31 = vld [vmem:[%s997_s0 + $0x58] sm:$0xff]  ;;  %v791_v33 = vcombine.low %v17_v27, %v21_v28  ;;  %v296_v48 = vadd.s32 256, %v294_v38 }
   0x8   :  { %203 = vmatprep.subr.bf16.mxu0 %v798_v16  ;;  %v29_v32 = vld [vmem:[%s997_s0 + $0x78] sm:$0xff]  ;;  %vm304_vm1 = vcmp.ge.s32.totalorder %v295_v40, %v302_v39  ;;  %vm313_vm2 = vcmp.lt.s32.totalorder %v295_v40, %v311_v41  ;;  %vm303_vm4 = vcmp.ge.s32.totalorder %v294_v38, %v302_v39  ;;  %vm312_vm5 = vcmp.lt.s32.totalorder %v294_v38, %v311_v41  ;;  %s850_s0 = smov 88  }
   0x9   :  { %v800_v34 = vcombine.high %v25_v31, %v29_v32  ;;  %v799_v35 = vcombine.low %v25_v31, %v29_v32  ;;  %vm321_vm3 = vmand %vm304_vm1, %vm313_vm2  ;;  %vm306_vm7 = vcmp.ge.s32.totalorder %v297_v47, %v302_v39  ;;  %vm315_vm8 = vcmp.lt.s32.totalorder %v297_v47, %v311_v41  ;;  %633 = vperm.xlu1 %840, %v898_v15  }
   0xa   :  { %122 = vmatpush1.bf16.msra.mxu1 %v793_v19  ;;  %v806_v43 = vsel %vm321_vm3, 1.0, %v849_v42  ;;  %vm320_vm6 = vmand %vm303_vm4, %vm312_vm5  ;;  %vm305_vm10 = vcmp.ge.s32.totalorder %v296_v48, %v302_v39  ;;  %vm314_vm11 = vcmp.lt.s32.totalorder %v296_v48, %v311_v41  ;;  %v299_v52 = vadd.s32 640, %v294_v38  ;;  %641 = vrot.lane.b32.xlu0 %v898_v15, %s850_s0 }
   0xb   :  { %204 = vmatpush1.bf16.msra.mxu0 %v797_v20  ;;  %160 = vmatprep.subr.bf16.mxu1 %v788_v21  ;;  %v345_v44 = vmul.f32 0.001953125, %v806_v43  ;;  %v805_v45 = vsel %vm320_vm6, 1.0, %v849_v42  ;;  %vm323_vm9 = vmand %vm306_vm7, %vm315_vm8  ;;  %v298_v53 = vadd.s32 512, %v294_v38  ;;  %v301_v56 = vadd.s32 896, %v294_v38 }
   0xc   :  { %v344_v46 = vmul.f32 0.001953125, %v805_v45  ;;  %v808_v49 = vsel %vm323_vm9, 1.0, %v849_v42  ;;  %vm938_vm12 = vmand %vm305_vm10, %vm314_vm11  ;;  %vm308_vm13 = vcmp.ge.s32.totalorder %v299_v52, %v302_v39  ;;  %vm317_vm14 = vcmp.lt.s32.totalorder %v299_v52, %v311_v41 }
   0xd   :  { %801 = vmatmul.mubr.msk.bf16.vlgmr.msra.gmra.mrb[0].mxu1 %vm115_vm0, %v13_v24  ;;  %352 = vmatprep.subr.mxu0 %v345_v44  ;;  %v347_v51 = vmul.f32 0.001953125, %v808_v49  ;;  %vm942_vm15 = vmand %vm308_vm13, %vm317_vm14  ;;  %vm316_vm1 = vcmp.lt.s32.totalorder %v298_v53, %v311_v41  ;;  %v300_v57 = vadd.s32 768, %v294_v38  ;;  %vm310_vm3 = vcmp.ge.s32.totalorder %v301_v56, %v302_v39 }
   0xe   :  { %803 = vmatmul.mubr.msk.bf16.vlgmr.msra.gmra.mrb[0].mxu0 %vm115_vm0, %v13_v24  ;;  %161 = vmatpush1.bf16.msra.mxu1 %v787_v25  ;;  %vm319_vm4 = vcmp.lt.s32.totalorder %v301_v56, %v311_v41  ;;  %v807_v2 = vsel %vm938_vm12, 1.0, %v849_v42  ;;  %v810_v6 = vsel %vm942_vm15, 1.0, %v849_v42  ;;  %vm852_vm9 = vmmov 0  }
   0xf   :  { %162 = vmatprep.subr.bf16.mxu1 %v796_v26  ;;  %192 = vmatprep.mubr.bf16.mxu1 %v847_v3  ;;  %vm950_vm5 = vmand %vm310_vm3, %vm319_vm4  ;;  %vm309_vm6 = vcmp.ge.s32.totalorder %v300_v57, %v302_v39  ;;  %vm318_vm7 = vcmp.lt.s32.totalorder %v300_v57, %v311_v41  ;;  %v346_v10 = vmul.f32 0.001953125, %v807_v2  ;;  %v349_v13 = vmul.f32 0.001953125, %v810_v6 }
  0x10   :  { %vm954_vm8 = vmand %vm309_vm6, %vm318_vm7  ;;  %v812_v22 = vsel %vm950_vm5, 1.0, %v849_v42  ;;  %v638_v43 = vsub.s32 0, %v931_v37  ;;  %v853_v44 = vmov 49   ;;  %vm647_vm10 = vcmask 64512  }
  0x11   :  { %v351_v27 = vmul.f32 0.001953125, %v812_v22  ;;  %v811_v32 = vsel %vm954_vm8, 1.0, %v849_v42  ;;  %841 = vset.pattern.permute.xlu1 %v853_v44  ;;  %842 = vset.pattern.permute.xlu0 %v853_v44  ;;  %vm726_vm11 = vcmask 9216   ;;  %vm761_vm13 = vcmask 534016  }
  0x12   :  { %163 = vmatpush1.bf16.msra.mxu1 %v795_v29  ;;  %v350_v36 = vmul.f32 0.001953125, %v811_v32  ;;  %721 = vperm.xlu1 %841, %v898_v15   ;;  %vm774_vm14 = vcmask 8192   ;;  %vm779_vm15 = vcmask 0  }
  0x13   :  { %242 = vmatprep.subr.bf16.mxu1 %v792_v30 }
  0x14   :  { %353 = vmatpush1.xpose.msra.mxu0 %v344_v46  ;;  %v639_v46 = vrot.slane %v898_v15, %v638_v43 }
  0x15   :  { %802 = vmatmul.mubr.msk.bf16.vlgmr.msra.gmra.mrb[4].mxu1 %vm115_vm0, %v13_v24  ;;  %422 = vmatprep.subr.mxu0 %v347_v51 }
  0x16   :  { %243 = vmatpush1.bf16.msra.mxu1 %v791_v33  ;;  %274 = vmatprep.mubr.bf16.mxu1 %v847_v3 }
  0x17   :  { %244 = vmatprep.subr.bf16.mxu1 %v800_v34 }
  0x1a   :  { %245 = vmatpush1.bf16.msra.mxu1 %v799_v35 }
  0x1b   :  { %817 = vmatprep.subr.mxu1 %v849_v42 }
  0x1d   :  { %804 = vmatmul.mubr.msk.bf16.vlgmr.msra.gmra.mrb[8].mxu1 %vm115_vm0, %v13_v24  ;;  %vm307_vm0 = vcmp.ge.s32.totalorder %v298_v53, %v302_v39 }
  0x1e   :  { %vm946_vm2 = vmand %vm307_vm0, %vm316_vm1  ;;  %819 = vmatprep.mubr.msk.f32.mxu1 %vm852_vm9, %v849_v42 }
  0x1f   :  { %v809_v18 = vsel %vm946_vm2, 1.0, %v849_v42 }
  0x20   :  { %v348_v25 = vmul.f32 0.001953125, %v809_v18 }
  0x85   :  { %v33_v61 = vpop.permute.xlu0 %32 }
  0x88   :  { %v634_v45 = vpop.permute.xlu1 %633 }
  0x89   :  { %v640_v47 = vmul.f32 %v639_v46, %v634_v45  ;;  %v642_v48 = vpop.permute.xlu0 %641 }
  0x8b   :  { %644 = vrot.lane.b32.xlu0 %v640_v47, %s854_s14 }
  0x91   :  { %v722_v53 = vpop.permute.xlu1 %721 }
  0xe0   :  { %v153_v62 = vpop.f32.mrb[0].mxu1 }
  0xe1   :  { %v154_v63 = vadd.f32 %v153_v62, %v33_v61  ;;  %v235_v0 = vpop.f32.mrb[0].mxu0  ;;  %v155_v1 = vpop.f32.mrb[1].mxu1 }
  0xe2   :  { %v156_v3 = vadd.f32 %v155_v1, %v33_v61  ;;  %v237_v4 = vpop.f32.mrb[1].mxu0  ;;  %v157_v5 = vpop.f32.mrb[2].mxu1  ;;  %v236_v30 = vadd.f32 %v235_v0, %v33_v61 }
  0xe3   :  { %v158_v7 = vpop.f32.mrb[3].mxu1  ;;  %v239_v8 = vpop.f32.mrb[2].mxu0  ;;  %v283_v12 = vmax.f32 %v154_v63, 0.0  ;;  %v238_v19 = vadd.f32 %v237_v4, %v33_v61 }
  0xe4   :  { %v284_v9 = vmax.f32 %v156_v3, 0.0  ;;  %v240_v11 = vpop.f32.mrb[3].mxu0  ;;  %v287_v38 = vmax.f32 %v236_v30, 0.0 }
  0xe5   :  { %v288_v28 = vmax.f32 %v238_v19, 0.0 }
  0xe6   :  { %416 = vmatprep.mubr.f32.mxu0 %v284_v9 }
  0xe7   :  { %417 = vmatmul.mubr.f32.vlgmr.msra.gmra.mrb[4].mxu0 %v283_v12 }
  0xe8   :  { %v194_v14 = vpop.f32.mrb[4].mxu1  ;;  %423 = vmatpush1.xpose.msra.mxu0 %v346_v10 }
  0xe9   :  { %v195_v16 = vadd.f32 %v194_v14, %v33_v61  ;;  %v196_v17 = vpop.f32.mrb[5].mxu1  ;;  %492 = vmatprep.subr.mxu0 %v349_v13  ;;  %v828_v13 = vtrunc.f32 %v898_v15 }
  0xea   :  { %v197_v20 = vadd.f32 %v196_v17, %v33_v61  ;;  %v198_v21 = vpop.f32.mrb[6].mxu1 }
  0xeb   :  { %v199_v23 = vpop.f32.mrb[7].mxu1  ;;  %v285_v26 = vmax.f32 %v195_v16, 0.0  ;;  %v829_v14 = vcvt.f32.s32 %v828_v13 }
  0xec   :  { %v286_v24 = vmax.f32 %v197_v20, 0.0 }
  0xed   :  { %v752_v16 = vrot.slane %v829_v14, %v638_v43 }
  0xee   :  { %486 = vmatprep.mubr.f32.mxu0 %v286_v24 }
  0xef   :  { %487 = vmatmul.mubr.f32.vlgmr.msra.gmra.mrb[4].mxu0 %v285_v26  ;;  %vm753_vm12 = vcmp.eq.s32.totalorder %v931_v37, %v752_v16 }
  0xf0   :  { %v276_v29 = vpop.f32.mrb[8].mxu1  ;;  %556 = vmatprep.mubr.f32.mxu0 %v288_v28  ;;  %493 = vmatpush1.xpose.msra.mxu0 %v348_v25  ;;  %v814_v17 = vsel %vm753_vm12, 1.0, %v849_v42 }
  0xf1   :  { %v278_v31 = vpop.f32.mrb[9].mxu1  ;;  %562 = vmatprep.subr.mxu0 %v351_v27  ;;  %v277_v40 = vadd.f32 %v276_v29, %v33_v61 }
  0xf2   :  { %v279_v33 = vadd.f32 %v278_v31, %v33_v61  ;;  %v280_v34 = vpop.f32.mrb[10].mxu1 }
  0xf3   :  { %v281_v35 = vpop.f32.mrb[11].mxu1  ;;  %v289_v41 = vmax.f32 %v277_v40, 0.0 }
  0xf4   :  { %v290_v39 = vmax.f32 %v279_v33, 0.0 }
  0xf7   :  { %557 = vmatmul.mubr.f32.vlgmr.msra.gmra.mrb[4].mxu0 %v287_v38 }
  0xf8   :  { %626 = vmatprep.mubr.f32.mxu0 %v290_v39  ;;  %563 = vmatpush1.xpose.msra.mxu0 %v350_v36 }
  0xfd   :  { %v645_v51 = vpop.permute.xlu0 %644 }
  0xff   :  { %627 = vmatmul.mubr.f32.vlgmr.msra.gmra.mrb[4].mxu0 %v289_v41 }
 0x1d2   :  { %v628_v49 = vpop.f32.mrb[4].mxu0 }
 0x1d3   :  { %v630_v50 = vpop.f32.mrb[5].mxu0  ;;  %818 = vmatpush3.msra.mxu1 %v628_v49 }
 0x1d4   :  { %820 = vmatmul.mubr.msk.f32.vlgmr.msra.gmra.mrb[12].mxu1 %vm647_vm10, %v642_v48 }
 0x2a7   :  { %v716_v52 = vpop.f32.mrb[12].mxu1 }
 0x2a8   :  { %v717_v54 = vadd.f32 %v716_v52, %v645_v51  ;;  %v821_v55 = vpop.f32.mrb[13].mxu1 }
 0x2aa   :  { %v724_v56 = vadd.f32 %v722_v53, %v717_v54 }
 0x2ac   :  { %727 = vst.msk [vmem:[%s999_s2] sm:$0x3] %vm726_vm11, %v724_v56  ;;  %v729_v57 = vsel %vm726_vm11, %v724_v56, -inf  ;;  %757 = vrot.lane.b32.xlu1 %v724_v56, %s855_s19 }
 0x2ad   :  { %v730_v58 = vrot.slane %v729_v57, 4 }
 0x2af   :  { %v731_v59 = vmax.f32 %v729_v57, %v730_v58 }
 0x2b1   :  { %v732_v60 = vrot.slane %v731_v59, 2 }
 0x2b3   :  { %v733_v61 = vmax.f32 %v731_v59, %v732_v60 }
 0x2b5   :  { %v734_v62 = vrot.slane %v733_v61, 1 }
 0x2b7   :  { %v735_v63 = vmax.f32 %v733_v61, %v734_v62 }
 0x2b9   :  { %v736_v0 = vsub.f32 %v724_v56, %v735_v63 }
 0x2bb   :  { %v737_v1 = vmul.f32 1.442695, %v736_v0 }
 0x2bd   :  { %843 = vpow2.f32 %v737_v1 }
 0x2c7   :  { %v844_v2 = vpop.eup %843 }
 0x2c8   :  { %v739_v3 = vsel %vm726_vm11, %v844_v2, 0.0 }
 0x2c9   :  { %v740_v4 = vrot.slane %v739_v3, 4 }
 0x2cb   :  { %v741_v5 = vadd.f32 %v740_v4, %v739_v3 }
 0x2cd   :  { %v742_v6 = vrot.slane %v741_v5, 2 }
 0x2cf   :  { %v743_v7 = vadd.f32 %v742_v6, %v741_v5 }
 0x2d1   :  { %v744_v8 = vrot.slane %v743_v7, 1 }
 0x2d3   :  { %v745_v9 = vadd.f32 %v744_v8, %v743_v7 }
 0x2d5   :  { %845 = vlog2.f32 %v745_v9 }
 0x2df   :  { %v846_v10 = vpop.eup %845 }
 0x2e0   :  { %v747_v11 = vmul.f32 0.6931472, %v846_v10 }
 0x2e2   :  { %v748_v12 = vadd.f32 %v747_v11, %v735_v63 }
 0x31e   :  { %v758_v18 = vpop.permute.xlu1 %757 }
 0x31f   :  { %v760_v19 = vmul.f32 %v814_v17, %v758_v18 }
 0x321   :  { %v762_v20 = vsel %vm761_vm13, %v760_v19, 0.0 }
 0x322   :  { %v763_v21 = vrot.slane %v762_v20, 4 }
 0x324   :  { %v764_v22 = vadd.f32 %v763_v21, %v762_v20 }
 0x326   :  { %v765_v23 = vrot.slane %v764_v22, 2 }
 0x328   :  { %v766_v24 = vadd.f32 %v765_v23, %v764_v22 }
 0x32a   :  { %v767_v25 = vrot.slane %v766_v24, 1 }
 0x32c   :  { %v768_v26 = vadd.f32 %v767_v25, %v766_v24 }
 0x32e   :  { %770 = vrot.lane.b32.xlu0 %v768_v26, %s855_s19 }
 0x3a0   :  { %v771_v27 = vpop.permute.xlu0 %770 }
 0x3a1   :  { %v773_v15 = vsub.f32 %v748_v12, %v771_v27 }
 0x3a3   :  { %v775_v28 = vsel %vm774_vm14, %v773_v15, 0.0 }
 0x3a4   :  { %776 = vadd.xlane.f32.xlu1 %v775_v28 }
 0x431   :  { %v777_v37 = vpop.xlane.xlu1 %776 }
 0x432   :  { %v778_v42 = vmul.f32 0.5, %v777_v37 }
 0x434   :  { %780 = vst.msk [vmem:[%s999_s2 + $0x2] sm:$0x1] %vm779_vm15, %v778_v42 }

</bundles_post_ra>
